<compile_context>
chip_gen: v6e
topology: v6e:2x2x1
jax: 0.10.0
libtpu: 0.0.40
codegen_flags: <defaults>
</compile_context>

<pallas_src>
import math
from functools import partial

import jax
import jax.numpy as jnp
from jax import lax
from jax.experimental import pallas as pl
from jax.experimental.pallas import tpu as pltpu

LANE = 128      # vreg lane width
TM_MIN = 16     # bf16 sublane packing -> minimum batch tile (bf16 min tile (16,128))


def _round_up(n, m):
    return ((n + m - 1) // m) * m


# ---------------------------------------------------------------------------
# Kernels
# ---------------------------------------------------------------------------
def _q_block(x_ref, w1_ref, b1_ref, w2_ref, b2_ref, w4_ref, b4_ref):
    """Fused fc_1 -> ReLU -> fc_2 -> ReLU -> fc_4 on one (tm, *) batch tile.

    x / weights are bf16 (MXU-native), accumulation + biases are f32, so h1/h2
    never touch HBM."""
    h1 = jnp.dot(x_ref[...], w1_ref[...], preferred_element_type=jnp.float32)
    h1 = jnp.maximum(h1 + b1_ref[...], 0.0)
    h2 = jnp.dot(h1.astype(jnp.bfloat16), w2_ref[...],
                 preferred_element_type=jnp.float32)
    h2 = jnp.maximum(h2 + b2_ref[...], 0.0)
    q = jnp.dot(h2.astype(jnp.bfloat16), w4_ref[...],
                preferred_element_type=jnp.float32)
    return q + b4_ref[...]


def dqn_q_kernel(x_ref, w1_ref, b1_ref, w2_ref, b2_ref, w4_ref, b4_ref, o_ref):
    # Training-loss path: full (padded) Q block.  Padded action columns are
    # exactly 0 and are sliced off in the wrapper.
    o_ref[...] = _q_block(x_ref, w1_ref, b1_ref, w2_ref, b2_ref, w4_ref, b4_ref)


def make_dqn_act_kernel(n_actions):
    """act() path: fuse argmax over the padded action lanes in-kernel and emit
    only a (tm, 1) int32 action column (cuts HBM writeback ~2x vs the
    128-lane-padded Q block)."""
    def dqn_act_kernel(x_ref, w1_ref, b1_ref, w2_ref, b2_ref, w4_ref, b4_ref,
                       a_ref):
        q = _q_block(x_ref, w1_ref, b1_ref, w2_ref, b2_ref, w4_ref, b4_ref)
        col = lax.broadcasted_iota(jnp.int32, q.shape, 1)
        # Mask padded action columns so they can never win the argmax.
        qm = jnp.where(col < n_actions, q, -jnp.inf)
        qmax = jnp.max(qm, axis=-1, keepdims=True)
        # First index attaining the max (matches torch.argmax tie-breaking).
        idx = jnp.where(qm == qmax, col, q.shape[-1])
        a_ref[...] = jnp.min(idx, axis=-1, keepdims=True).astype(jnp.int32)
    return dqn_act_kernel


# ---------------------------------------------------------------------------
# One-time parameter preparation (pad + cast at init / weight-update time,
# NOT per forward call).
# ---------------------------------------------------------------------------
def prepare_dqn_params(w1, b1, w2, b2, w4, b4):
    """Pad weights/biases once to lane-dense (multiples of 128) shapes, cast
    weights to bf16 (MXU-native) and biases to f32."""
    b1 = jnp.reshape(b1, (1, -1))
    b2 = jnp.reshape(b2, (1, -1))
    b4 = jnp.reshape(b4, (1, -1))

    D, H1 = w1.shape
    H2 = w2.shape[1]
    A = w4.shape[1]
    assert w2.shape[0] == H1 and w4.shape[0] == H2, (
        "forward applies fc_4 to fc_2's output => fc_3_dims must equal fc_2_dims")

    Dp, H1p, H2p, Ap = (_round_up(d, LANE) for d in (D, H1, H2, A))

    def pad2(a, rows, cols, dtype):
        return jnp.pad(a, ((0, rows - a.shape[0]),
                           (0, cols - a.shape[1]))).astype(dtype)

    return (pad2(w1, Dp, H1p, jnp.bfloat16), pad2(b1, 1, H1p, jnp.float32),
            pad2(w2, H1p, H2p, jnp.bfloat16), pad2(b2, 1, H2p, jnp.float32),
            pad2(w4, H2p, Ap, jnp.bfloat16), pad2(b4, 1, Ap, jnp.float32))


# ---------------------------------------------------------------------------
# Batch tiling and pallas_call plumbing
# ---------------------------------------------------------------------------
def _batch_tiling(B, tm_max):
    # Cap tm so that sufficiently large batches give >= 2 grid steps (v7x:
    # both TensorCores get work via the "parallel" batch axis) ...
    tm = max(TM_MIN, min(tm_max, _round_up(pl.cdiv(B, 2), TM_MIN)))
    # ... then rebalance tm across the resulting grid so batch padding stays
    # under one sublane group per tile (avoids ~2x waste for awkward B).
    g = pl.cdiv(B, tm)
    tm = _round_up(pl.cdiv(B, g), TM_MIN)
    return tm, g * tm


def _call_dqn(kernel, x, params, out_dtype, out_cols, tm_max):
    w1p, b1p, w2p, b2p, w4p, b4p = params
    B, D = x.shape
    Dp = w1p.shape[0]
    assert D <= Dp

    tm, Bp = _batch_tiling(B, tm_max)
    # bf16 x: halves HBM->VMEM DMA of the dominant streaming input.
    xp = jnp.pad(x.astype(jnp.bfloat16), ((0, Bp - B), (0, Dp - D)))

    def resident(a):
        # Same block index every grid step -> stays VMEM-resident.
        # (On v7x with 4k+ hidden dims, pipeline_mode=pl.Buffered(1) here would
        # single-buffer the resident weights; irrelevant at these sizes.)
        return pl.BlockSpec(a.shape, lambda i: (0, 0))

    out = pl.pallas_call(
        kernel,
        out_shape=jax.ShapeDtypeStruct((Bp, out_cols), out_dtype),
        grid=(Bp // tm,),
        in_specs=[pl.BlockSpec((tm, Dp), lambda i: (i, 0)),
                  resident(w1p), resident(b1p),
                  resident(w2p), resident(b2p),
                  resident(w4p), resident(b4p)],
        out_specs=pl.BlockSpec((tm, out_cols), lambda i: (i, 0)),
        compiler_params=pltpu.CompilerParams(
            dimension_semantics=("parallel",)),
    )(xp, w1p, b1p, w2p, b2p, w4p, b4p)
    return out[:B]


def deep_q_network_forward(x, params, *, n_actions, tm_max=512):
    """Q-values path: (B, input_dims) f32 -> (B, n_actions) f32."""
    Ap = params[4].shape[1]
    q = _call_dqn(dqn_q_kernel, x, params, jnp.float32, Ap, tm_max)
    return q[:, :n_actions]


def deep_q_network_act(x, params, *, n_actions, tm_max=512):
    """Action-selection path: (B, input_dims) f32 -> (B,) int32 argmax_a Q."""
    kernel = make_dqn_act_kernel(n_actions)
    a = _call_dqn(kernel, x, params, jnp.int32, 1, tm_max)
    return a[:, 0]


# ---------------------------------------------------------------------------
# Demo / self-test
# ---------------------------------------------------------------------------
def init_linear_params(key, fan_in, fan_out):
    """PyTorch nn.Linear default init (uniform +-1/sqrt(fan_in)), weight
    pre-transposed to (fan_in, fan_out), bias as (1, fan_out)."""
    k_w, k_b = jax.random.split(key)
    bound = 1.0 / math.sqrt(fan_in)
    w = jax.random.uniform(k_w, (fan_in, fan_out), jnp.float32, -bound, bound)
    b = jax.random.uniform(k_b, (1, fan_out), jnp.float32, -bound, bound)
    return w, b


if __name__ == "__main__":
    batch = 8
    input_dims = 16
    fc_1_dims = 32
    fc_2_dims = 32
    fc_3_dims = 32   # must equal fc_2_dims for the reference forward to be valid
    n_actions = 4

    key = jax.random.PRNGKey(0)
    k_x, k1, k2, k4 = jax.random.split(key, 4)

    x = jax.random.normal(k_x, (batch, input_dims), jnp.float32)
    w1, b1 = init_linear_params(k1, input_dims, fc_1_dims)
    w2, b2 = init_linear_params(k2, fc_1_dims, fc_2_dims)
    w4, b4 = init_linear_params(k4, fc_3_dims, n_actions)

    # One-time prep (re-run only on weight updates / target-network sync).
    params = prepare_dqn_params(w1, b1, w2, b2, w4, b4)
    params = jax.block_until_ready(params)

    forward = jax.jit(partial(deep_q_network_forward, n_actions=n_actions))
    act = jax.jit(partial(deep_q_network_act, n_actions=n_actions))

    q_values = forward(x, params)
    actions = act(x, params)
    jax.block_until_ready((q_values, actions))

    # Pure-JAX f32 reference of the same forward pass.
    h1 = jnp.maximum(x @ w1 + b1, 0.0)
    h2 = jnp.maximum(h1 @ w2 + b2, 0.0)
    ref_q = h2 @ w4 + b4

    assert q_values.shape == (batch, n_actions)
    assert q_values.dtype == jnp.float32
    # bf16 matmul inputs with f32 accumulation -> loosened tolerance.
    max_err = float(jnp.max(jnp.abs(q_values - ref_q)))
    assert jnp.allclose(q_values, ref_q, atol=3e-2, rtol=3e-2), max_err

    assert actions.shape == (batch,)
    assert actions.dtype == jnp.int32
    # Fused in-kernel argmax must agree exactly with argmax over the kernel's
    # own Q output (avoids bf16 tie-flip flakiness vs the f32 reference).
    assert jnp.array_equal(actions,
                           jnp.argmax(q_values, axis=-1).astype(jnp.int32))

    print("KERNEL_OK")
</pallas_src>

<mosaic_0001>
module attributes {stable_mosaic.version = 11 : i64} {
  func.func @dqn_q_kernel(%arg0: i32, %arg1: memref<16x128xbf16, #tpu.memory_space<vmem>>, %arg2: memref<128x128xbf16, #tpu.memory_space<vmem>>, %arg3: memref<1x128xf32, #tpu.memory_space<vmem>>, %arg4: memref<128x128xbf16, #tpu.memory_space<vmem>>, %arg5: memref<1x128xf32, #tpu.memory_space<vmem>>, %arg6: memref<128x128xbf16, #tpu.memory_space<vmem>>, %arg7: memref<1x128xf32, #tpu.memory_space<vmem>>, %arg8: memref<16x128xf32, #tpu.memory_space<vmem>>) attributes {dimension_semantics = [#tpu.dimension_semantics<parallel>], iteration_bounds = array<i64: 1>, scalar_prefetch = 0 : i64, scratch_operands = 0 : i64, tpu.core_type = #tpu.core_type<tc>, window_params = [{transform_indices = @transform_0, window_bounds = array<i64: 16, 128>}, {pipeline_mode = #tpu.pipeline_mode<synchronous>, transform_indices = @transform_1, window_bounds = array<i64: 128, 128>}, {pipeline_mode = #tpu.pipeline_mode<synchronous>, transform_indices = @transform_2, window_bounds = array<i64: 1, 128>}, {pipeline_mode = #tpu.pipeline_mode<synchronous>, transform_indices = @transform_3, window_bounds = array<i64: 128, 128>}, {pipeline_mode = #tpu.pipeline_mode<synchronous>, transform_indices = @transform_4, window_bounds = array<i64: 1, 128>}, {pipeline_mode = #tpu.pipeline_mode<synchronous>, transform_indices = @transform_5, window_bounds = array<i64: 128, 128>}, {pipeline_mode = #tpu.pipeline_mode<synchronous>, transform_indices = @transform_6, window_bounds = array<i64: 1, 128>}, {transform_indices = @transform_7, window_bounds = array<i64: 16, 128>}]} {
    %c0 = arith.constant 0 : index
    %c0_0 = arith.constant 0 : index
    %0 = vector.load %arg1[%c0, %c0_0] : memref<16x128xbf16, #tpu.memory_space<vmem>>, vector<16x128xbf16>
    %c0_1 = arith.constant 0 : index
    %c0_2 = arith.constant 0 : index
    %1 = vector.load %arg2[%c0_1, %c0_2] : memref<128x128xbf16, #tpu.memory_space<vmem>>, vector<128x128xbf16>
    %cst = arith.constant dense<0.000000e+00> : vector<16x128xf32>
    %2 = tpu.matmul %0, %1, %cst {dimension_numbers = #tpu.dot_dimension_numbers<[1], [0], [0], [1], [0, 0, 1, 1], [], []>} : vector<16x128xbf16>, vector<128x128xbf16>, vector<16x128xf32> -> vector<16x128xf32>
    %c0_3 = arith.constant 0 : index
    %c0_4 = arith.constant 0 : index
    %3 = vector.load %arg3[%c0_3, %c0_4] : memref<1x128xf32, #tpu.memory_space<vmem>>, vector<1x128xf32>
    %4 = vector.broadcast %3 : vector<1x128xf32> to vector<16x128xf32>
    %5 = arith.addf %2, %4 : vector<16x128xf32>
    %cst_5 = arith.constant 0.000000e+00 : f32
    %6 = vector.broadcast %cst_5 : f32 to vector<16x128xf32>
    %7 = arith.maximumf %5, %6 : vector<16x128xf32>
    %8 = arith.truncf %7 : vector<16x128xf32> to vector<16x128xbf16>
    %c0_6 = arith.constant 0 : index
    %c0_7 = arith.constant 0 : index
    %9 = vector.load %arg4[%c0_6, %c0_7] : memref<128x128xbf16, #tpu.memory_space<vmem>>, vector<128x128xbf16>
    %cst_8 = arith.constant dense<0.000000e+00> : vector<16x128xf32>
    %10 = tpu.matmul %8, %9, %cst_8 {dimension_numbers = #tpu.dot_dimension_numbers<[1], [0], [0], [1], [0, 0, 1, 1], [], []>} : vector<16x128xbf16>, vector<128x128xbf16>, vector<16x128xf32> -> vector<16x128xf32>
    %c0_9 = arith.constant 0 : index
    %c0_10 = arith.constant 0 : index
    %11 = vector.load %arg5[%c0_9, %c0_10] : memref<1x128xf32, #tpu.memory_space<vmem>>, vector<1x128xf32>
    %12 = vector.broadcast %11 : vector<1x128xf32> to vector<16x128xf32>
    %13 = arith.addf %10, %12 : vector<16x128xf32>
    %cst_11 = arith.constant 0.000000e+00 : f32
    %14 = vector.broadcast %cst_11 : f32 to vector<16x128xf32>
    %15 = arith.maximumf %13, %14 : vector<16x128xf32>
    %16 = arith.truncf %15 : vector<16x128xf32> to vector<16x128xbf16>
    %c0_12 = arith.constant 0 : index
    %c0_13 = arith.constant 0 : index
    %17 = vector.load %arg6[%c0_12, %c0_13] : memref<128x128xbf16, #tpu.memory_space<vmem>>, vector<128x128xbf16>
    %cst_14 = arith.constant dense<0.000000e+00> : vector<16x128xf32>
    %18 = tpu.matmul %16, %17, %cst_14 {dimension_numbers = #tpu.dot_dimension_numbers<[1], [0], [0], [1], [0, 0, 1, 1], [], []>} : vector<16x128xbf16>, vector<128x128xbf16>, vector<16x128xf32> -> vector<16x128xf32>
    %c0_15 = arith.constant 0 : index
    %c0_16 = arith.constant 0 : index
    %19 = vector.load %arg7[%c0_15, %c0_16] : memref<1x128xf32, #tpu.memory_space<vmem>>, vector<1x128xf32>
    %20 = vector.broadcast %19 : vector<1x128xf32> to vector<16x128xf32>
    %21 = arith.addf %18, %20 : vector<16x128xf32>
    %c0_17 = arith.constant 0 : index
    %c0_18 = arith.constant 0 : index
    %22 = vector.load %arg8[%c0_17, %c0_18] : memref<16x128xf32, #tpu.memory_space<vmem>>, vector<16x128xf32>
    tpu.vector_store %arg8[%c0_17, %c0_18], %21 {strides = array<i32>} : memref<16x128xf32, #tpu.memory_space<vmem>>, vector<16x128xf32>,
    return
  }
  func.func @transform_0(%arg0: i32) -> (i32, i32) {
    %c0_i32 = arith.constant 0 : i32
    %c0_i32_0 = arith.constant 0 : i32
    return %arg0, %c0_i32 : i32, i32
  }
  func.func @transform_1(%arg0: i32) -> (i32, i32) {
    %c0_i32 = arith.constant 0 : i32
    %c0_i32_0 = arith.constant 0 : i32
    %c0_i32_1 = arith.constant 0 : i32
    return %c0_i32, %c0_i32_0 : i32, i32
  }
  func.func @transform_2(%arg0: i32) -> (i32, i32) {
    %c0_i32 = arith.constant 0 : i32
    %c0_i32_0 = arith.constant 0 : i32
    %c0_i32_1 = arith.constant 0 : i32
    return %c0_i32, %c0_i32_0 : i32, i32
  }
  func.func @transform_3(%arg0: i32) -> (i32, i32) {
    %c0_i32 = arith.constant 0 : i32
    %c0_i32_0 = arith.constant 0 : i32
    %c0_i32_1 = arith.constant 0 : i32
    return %c0_i32, %c0_i32_0 : i32, i32
  }
  func.func @transform_4(%arg0: i32) -> (i32, i32) {
    %c0_i32 = arith.constant 0 : i32
    %c0_i32_0 = arith.constant 0 : i32
    %c0_i32_1 = arith.constant 0 : i32
    return %c0_i32, %c0_i32_0 : i32, i32
  }
  func.func @transform_5(%arg0: i32) -> (i32, i32) {
    %c0_i32 = arith.constant 0 : i32
    %c0_i32_0 = arith.constant 0 : i32
    %c0_i32_1 = arith.constant 0 : i32
    return %c0_i32, %c0_i32_0 : i32, i32
  }
  func.func @transform_6(%arg0: i32) -> (i32, i32) {
    %c0_i32 = arith.constant 0 : i32
    %c0_i32_0 = arith.constant 0 : i32
    %c0_i32_1 = arith.constant 0 : i32
    return %c0_i32, %c0_i32_0 : i32, i32
  }
  func.func @transform_7(%arg0: i32) -> (i32, i32) {
    %c0_i32 = arith.constant 0 : i32
    %c0_i32_0 = arith.constant 0 : i32
    return %arg0, %c0_i32 : i32, i32
  }
}

</mosaic_0001>

<bundles_post_ra>
// kernel: deep_q_network_forward.1
= control target key start
LH: loop header
LB: loop body
LE: loop exit
PB: predicated region body
PF: predicated region fallthrough
CT: control target
= control target key end

     0   :  { %12 = vsyncpa [#allocation3], 0  ;;  %s741_s0 = inlined_call_operand.vmem [shape: bf16[16,128], index: 0, kind: input, shape index: {}]   ;;  %s742_s1 = inlined_call_operand.hbm [shape: bf16[128,128], index: 1, kind: input, shape index: {}]   ;;  %s743_s2 = inlined_call_operand.vmem [shape: f32[1,128], index: 2, kind: input, shape index: {}]   ;;  %s744_s3 = inlined_call_operand.hbm [shape: bf16[128,128], index: 3, kind: input, shape index: {}]   ;;  %s745_s4 = inlined_call_operand.vmem [shape: f32[1,128], index: 4, kind: input, shape index: {}]   ;;  %s746_s5 = inlined_call_operand.hbm [shape: bf16[128,128], index: 5, kind: input, shape index: {}]   ;;  %s747_s6 = inlined_call_operand.vmem [shape: f32[1,128], index: 6, kind: input, shape index: {}]   ;;  %s748_s7 = inlined_call_operand.vmem [shape: f32[16,128], index: 7, kind: output, shape index: {}]  }
   0x1   :  { %13 = vsyncpa [#allocation5], 0  ;;  %s637_s24 = smov [#allocation4]   ;;  %s638_s26 = smov [#allocation2]  }
   0x2   :  { %s35_s25 = sshll.u32 %s637_s24, 4  ;;  %s21_s27 = sshll.u32 %s638_s26, 4  ;;  %s36_s25 = int_to_ptr.vmem [resolvable:$true] %s35_s25  ;;  %s22_s27 = int_to_ptr.vmem [resolvable:$true] %s21_s27 }
   0x3   :  { %s581_s28 = scalar_lea.vmem %s36_s25, 1024  ;;  %p586_p1 = scmp.lt.s32.totalorder %s36_s25, %s36_s25 }
   0x4   :  { %p582_p0 = scmp.ne.s32.totalorder %s36_s25, %s581_s28  ;;  %p587_p2 = scmp.lt.s32.totalorder %s581_s28, %s581_s28 }
   0x6   :  { %p588_p3 = por %p587_p2, %p586_p1 }
   0x8   :  { %p589_p4 = pnand %p588_p3, %p582_p0 }
   0xa   :  { %592 = shalt.err (!%p589_p4)
}
   0xb   :  { %s639_s29 = smov 64   ;;  %s640_s30 = smov 4  }
   0xc   :  { %41 = dma.hbm_to_vmem [thread:$0]  %s744_s3, 1024, %s36_s25, [#allocation5], %s639_s29, %s639_s29, %s640_s30  }
   0xd   :  { %s601_s10 = scalar_lea.vmem %s22_s27, 1024  ;;  %p606_p6 = scmp.lt.s32.totalorder %s22_s27, %s22_s27 }
   0xe   :  { %p602_p5 = scmp.ne.s32.totalorder %s22_s27, %s601_s10  ;;  %p607_p7 = scmp.lt.s32.totalorder %s601_s10, %s601_s10 }
  0x10   :  { %p608_p8 = por %p607_p7, %p606_p6 }
  0x12   :  { %p609_p9 = pnand %p608_p8, %p602_p5 }
  0x14   :  { %612 = shalt.err (!%p609_p9)
}
  0x15   :  { %27 = dma.hbm_to_vmem [thread:$0]  %s742_s1, 1024, %s22_s27, [#allocation3], %s639_s29, %s639_s29, %s640_s30  }
  0x16   :  { %s641_s13 = smov [#allocation6]  }
  0x17   :  { %s49_s14 = sshll.u32 %s641_s13, 4  ;;  %s50_s14 = int_to_ptr.vmem [resolvable:$true] %s49_s14 }
  0x18   :  { %s621_s15 = scalar_lea.vmem %s50_s14, 1024  ;;  %p626_p11 = scmp.lt.s32.totalorder %s50_s14, %s50_s14 }
  0x19   :  { %p622_p10 = scmp.ne.s32.totalorder %s50_s14, %s621_s15  ;;  %p627_p12 = scmp.lt.s32.totalorder %s621_s15, %s621_s15 }
  0x1b   :  { %p628_p13 = por %p627_p12, %p626_p11 }
  0x1d   :  { %p629_p0 = pnand %p628_p13, %p622_p10 }
  0x1f   :  { %632 = shalt.err (!%p629_p0)
}
  0x20   :  { %55 = dma.hbm_to_vmem [thread:$0]  %s746_s5, 1024, %s50_s14, [#allocation5], %s639_s29, %s639_s29, %s640_s30  }
  0x21   :  { %633 = dma.done.wait [#allocation3], 1024  }
  0x22   :  { %634 = vsyncadd [#allocation3], 4294966272 }
  0x23   :  { %635 = dma.done.wait [#allocation5], 2048  }
  0x24   :  { %636 = vsyncadd [#allocation5], 4294965248  ;;  %v642_v0 = vmov 0.0   ;;  %vm643_vm0 = vmmov 0   ;;  %v548_v1 = vld [vmem:[#allocation2 + $0x38] sm:$0xff]   ;;  %v549_v2 = vld [vmem:[#allocation2 + $0x30] sm:$0xff]  }
  0x25   :  { %481 = vmatprep.subr.bf16.mxu0 %v642_v0  ;;  %497 = vmatprep.mubr.msk.bf16.mxu0 %vm643_vm0, %v642_v0  ;;  %v550_v3 = vld [vmem:[#allocation2 + $0x28] sm:$0xff]   ;;  %v557_v4 = vld [vmem:[#allocation4 + $0x38] sm:$0xff]   ;;  %v551_v5 = vld [vmem:[#allocation2 + $0x20] sm:$0xff]  }
  0x26   :  { %501 = vmatprep.subr.bf16.mxu1 %v642_v0  ;;  %517 = vmatprep.mubr.msk.bf16.mxu1 %vm643_vm0, %v642_v0  ;;  %v558_v6 = vld [vmem:[#allocation4 + $0x30] sm:$0xff]   ;;  %v552_v7 = vld [vmem:[#allocation2 + $0x18] sm:$0xff]   ;;  %v559_v8 = vld [vmem:[#allocation4 + $0x28] sm:$0xff]  }
  0x27   :  { %482 = vmatpush3.bf16.msra.mxu0 %v548_v1  ;;  %502 = vmatpush3.bf16.msra.mxu1 %v557_v4  ;;  %v553_v9 = vld [vmem:[#allocation2 + $0x10] sm:$0xff]   ;;  %v560_v10 = vld [vmem:[#allocation4 + $0x20] sm:$0xff]   ;;  %v554_v11 = vld [vmem:[#allocation2 + $0x8] sm:$0xff]  }
  0x28   :  { %483 = vmatprep.subr.bf16.mxu0 %v642_v0  ;;  %503 = vmatprep.subr.bf16.mxu1 %v642_v0  ;;  %v561_v12 = vld [vmem:[#allocation4 + $0x18] sm:$0xff]   ;;  %v555_v13 = vld [vmem:[#allocation2] sm:$0xff]   ;;  %v562_v15 = vld [vmem:[#allocation4 + $0x10] sm:$0xff]  }
  0x29   :  { %v556_v14 = vld [vmem:[%s741_s0] sm:$0xff]   ;;  %v563_v16 = vld [vmem:[#allocation4 + $0x8] sm:$0xff]   ;;  %v565_v18 = vld [vmem:[#allocation6 + $0x38] sm:$0xff]  }
  0x2a   :  { %v564_v17 = vld [vmem:[#allocation4] sm:$0xff]   ;;  %v566_v19 = vld [vmem:[#allocation6 + $0x30] sm:$0xff]   ;;  %v567_v20 = vld [vmem:[#allocation6 + $0x28] sm:$0xff]  }
  0x2b   :  { %484 = vmatpush3.bf16.msra.mxu0 %v549_v2  ;;  %504 = vmatpush3.bf16.msra.mxu1 %v558_v6  ;;  %v568_v21 = vld [vmem:[#allocation6 + $0x20] sm:$0xff]   ;;  %v569_v22 = vld [vmem:[#allocation6 + $0x18] sm:$0xff]   ;;  %v570_v33 = vld [vmem:[#allocation6 + $0x10] sm:$0xff]  }
  0x2c   :  { %485 = vmatprep.subr.bf16.mxu0 %v642_v0  ;;  %505 = vmatprep.subr.bf16.mxu1 %v642_v0  ;;  %v426_v23 = vld [vmem:[%s743_s2] ss:$0 sm:$0xff]  ;;  %v571_v34 = vld [vmem:[#allocation6 + $0x8] sm:$0xff]  }
  0x2d   :  { %v572_v35 = vld [vmem:[#allocation6] sm:$0xff]  }
  0x2e   :  { %v436_v36 = vld [vmem:[%s745_s4] ss:$0 sm:$0xff] }
  0x2f   :  { %486 = vmatpush3.bf16.msra.mxu0 %v550_v3  ;;  %506 = vmatpush3.bf16.msra.mxu1 %v559_v8  ;;  %v445_v46 = vld [vmem:[%s747_s6] ss:$0 sm:$0xff] }
  0x30   :  { %487 = vmatprep.subr.bf16.mxu0 %v642_v0  ;;  %507 = vmatprep.subr.bf16.mxu1 %v642_v0 }
  0x33   :  { %488 = vmatpush3.bf16.msra.mxu0 %v551_v5  ;;  %508 = vmatpush3.bf16.msra.mxu1 %v560_v10 }
  0x34   :  { %489 = vmatprep.subr.bf16.mxu0 %v642_v0  ;;  %509 = vmatprep.subr.bf16.mxu1 %v642_v0 }
  0x37   :  { %490 = vmatpush3.bf16.msra.mxu0 %v552_v7  ;;  %510 = vmatpush3.bf16.msra.mxu1 %v561_v12 }
  0x38   :  { %491 = vmatprep.subr.bf16.mxu0 %v642_v0  ;;  %511 = vmatprep.subr.bf16.mxu1 %v642_v0 }
  0x3b   :  { %492 = vmatpush3.bf16.msra.mxu0 %v553_v9  ;;  %512 = vmatpush3.bf16.msra.mxu1 %v562_v15 }
  0x3c   :  { %493 = vmatprep.subr.bf16.mxu0 %v642_v0  ;;  %513 = vmatprep.subr.bf16.mxu1 %v642_v0 }
  0x3f   :  { %494 = vmatpush3.bf16.msra.mxu0 %v554_v11  ;;  %514 = vmatpush3.bf16.msra.mxu1 %v563_v16 }
  0x40   :  { %495 = vmatprep.subr.bf16.mxu0 %v642_v0  ;;  %515 = vmatprep.subr.bf16.mxu1 %v642_v0 }
  0x43   :  { %496 = vmatpush3.bf16.msra.mxu0 %v555_v13  ;;  %516 = vmatpush3.bf16.msra.mxu1 %v564_v17 }
  0x44   :  { %521 = vmatprep.subr.bf16.mxu0 %v642_v0 }
  0x46   :  { %498 = vmatmul.mubr.bf16.vlgmr.msra.gmra.mxu0 %v556_v14 }
  0x47   :  { %537 = vmatprep.mubr.msk.bf16.mxu0 %vm643_vm0, %v642_v0  ;;  %522 = vmatpush3.bf16.msra.mxu0 %v565_v18 }
  0x48   :  { %523 = vmatprep.subr.bf16.mxu0 %v642_v0 }
  0x4b   :  { %524 = vmatpush3.bf16.msra.mxu0 %v566_v19 }
  0x4c   :  { %525 = vmatprep.subr.bf16.mxu0 %v642_v0 }
  0x4f   :  { %526 = vmatpush3.bf16.msra.mxu0 %v567_v20 }
  0x50   :  { %527 = vmatprep.subr.bf16.mxu0 %v642_v0 }
  0x53   :  { %528 = vmatpush3.bf16.msra.mxu0 %v568_v21 }
  0x54   :  { %529 = vmatprep.subr.bf16.mxu0 %v642_v0 }
  0x57   :  { %530 = vmatpush3.bf16.msra.mxu0 %v569_v22 }
  0x58   :  { %531 = vmatprep.subr.bf16.mxu0 %v642_v0 }
  0x5b   :  { %532 = vmatpush3.bf16.msra.mxu0 %v570_v33 }
  0x5c   :  { %533 = vmatprep.subr.bf16.mxu0 %v642_v0 }
  0x5f   :  { %534 = vmatpush3.bf16.msra.mxu0 %v571_v34 }
  0x60   :  { %535 = vmatprep.subr.bf16.mxu0 %v642_v0 }
  0x63   :  { %536 = vmatpush3.bf16.msra.mxu0 %v572_v35 }
 0x106   :  { %v181_v24 = vpop.f32.mrf.mxu0 }
 0x107   :  { %v182_v26 = vadd.f32 %v426_v23, %v181_v24 }
 0x108   :  { %v499_v25 = vpop.f32.mrf.mxu0 }
 0x109   :  { %v188_v30 = vmax.f32 %v182_v26, 0.0 }
 0x10a   :  { %v184_v27 = vpop.f32.mrf.mxu0 }
 0x10b   :  { %v185_v28 = vadd.f32 %v426_v23, %v184_v27 }
 0x10c   :  { %v500_v29 = vpop.f32.mrf.mxu0 }
 0x10d   :  { %v189_v31 = vmax.f32 %v185_v28, 0.0 }
 0x10f   :  { %v190_v32 = vpack.c.bf16 %v189_v31, %v188_v30 }
 0x111   :  { %518 = vmatmul.mubr.bf16.vlgmr.msra.gmra.mxu1 %v190_v32 }
 0x1d1   :  { %v296_v37 = vpop.f32.mrf.mxu1 }
 0x1d2   :  { %v297_v39 = vadd.f32 %v436_v36, %v296_v37 }
 0x1d3   :  { %v519_v38 = vpop.f32.mrf.mxu1 }
 0x1d4   :  { %v303_v43 = vmax.f32 %v297_v39, 0.0 }
 0x1d5   :  { %v299_v40 = vpop.f32.mrf.mxu1 }
 0x1d6   :  { %v300_v41 = vadd.f32 %v436_v36, %v299_v40 }
 0x1d7   :  { %v520_v42 = vpop.f32.mrf.mxu1 }
 0x1d8   :  { %v304_v44 = vmax.f32 %v300_v41, 0.0 }
 0x1da   :  { %v305_v45 = vpack.c.bf16 %v304_v44, %v303_v43 }
 0x1dc   :  { %538 = vmatmul.mubr.bf16.vlgmr.msra.gmra.mxu0 %v305_v45 }
 0x29c   :  { %v411_v47 = vpop.f32.mrf.mxu0 }
 0x29d   :  { %v412_v48 = vadd.f32 %v445_v46, %v411_v47 }
 0x29e   :  { %v539_v49 = vpop.f32.mrf.mxu0 }
 0x29f   :  { %418 = vst [vmem:[%s748_s7] sm:$0xff] %v412_v48 }
 0x2a0   :  { %v414_v50 = vpop.f32.mrf.mxu0 }
 0x2a1   :  { %v415_v51 = vadd.f32 %v445_v46, %v414_v50 }
 0x2a2   :  { %v540_v52 = vpop.f32.mrf.mxu0 }
 0x2a3   :  { %419 = vst [vmem:[%s748_s7 + $0x8] sm:$0xff] %v415_v51 }
 0x2a4   :  { %424 = vsyncpa [#allocation3], 1 }
 0x2a5   :  { %425 = vsyncpa [#allocation5], 1 }

</bundles_post_ra>
